<compile_context>
chip_gen: v6e
topology: v6e:2x2x1
jax: 0.10.0
libtpu: 0.0.40
codegen_flags: <defaults>
</compile_context>

<pallas_src>
import functools
import math

import numpy as np
import jax
import jax.numpy as jnp
from jax.experimental import pallas as pl
from jax.experimental.pallas import tpu as pltpu

LOG_STD_MIN = -20.0
LOG_STD_MAX = 2.0
_HALF_LOG_2PI = 0.5 * math.log(2.0 * math.pi)   # hoisted Python-float constants
_LOG2 = math.log(2.0)


def _actor_kernel(obs_ref, eps_ref,
                  w0_ref, b0_ref, w1_ref, b1_ref,
                  wh_ref, bh_ref,
                  out_ref, *, act_dim):
    x = obs_ref[...]

    # net: Linear + ReLU, Linear + ReLU (output_activation == activation == ReLU)
    h = jnp.dot(x, w0_ref[...], preferred_element_type=jnp.float32) + b0_ref[...]
    h = jnp.maximum(h, 0.0)
    h = jnp.dot(h, w1_ref[...], preferred_element_type=jnp.float32) + b1_ref[...]
    h = jnp.maximum(h, 0.0)

    # fused heads: one MXU matmul producing [mu | log_std]
    head = jnp.dot(h, wh_ref[...], preferred_element_type=jnp.float32) + bh_ref[...]
    mu = head[:, :act_dim]
    log_std = jnp.clip(head[:, act_dim:], LOG_STD_MIN, LOG_STD_MAX)
    std = jnp.exp(log_std)                      # EUP

    eps = eps_ref[...]
    pi_action = mu + std * eps                  # rsample(): mu + std * N(0,1)

    # Normal(mu, std).log_prob(pi_action): (pi_action - mu)/std == eps exactly.
    log_prob = -0.5 * (eps * eps) - log_std - _HALF_LOG_2PI

    # tanh-squash correction: 2*(log 2 - a - softplus(-2a)), stable softplus form.
    t = -2.0 * pi_action
    softplus_t = jnp.maximum(t, 0.0) + jnp.log1p(jnp.exp(-jnp.abs(t)))
    corr = 2.0 * (_LOG2 - pi_action - softplus_t)

    # single cross-lane (XLU) reduction for the whole logp path
    logp = jnp.sum(log_prob - corr, axis=-1, keepdims=True)

    # single lane-packed output slab: [tanh(pi) (act) | mu (act) | logp (1)]
    out_ref[...] = jnp.concatenate([jnp.tanh(pi_action), mu, logp], axis=-1)


def _round_up(x, m):
    return ((x + m - 1) // m) * m


def squashed_gaussian_actor_forward(obs, eps, params, *, block_b=1024):
    """Whole forward pass (deterministic=False, with_logprob=True) inside one
    batch-gridded Pallas kernel. Returns (pi_action, mu, logp_pi)."""
    B, obs_dim = obs.shape
    act_dim = eps.shape[1]
    hid0 = params["w0"].shape[1]
    hid1 = params["w1"].shape[1]
    out_w = 2 * act_dim + 1

    # fuse mu / log_std heads into a single [hidden, 2*act_dim] weight / bias
    wh = jnp.concatenate([params["wmu"], params["wls"]], axis=1)
    bh = jnp.concatenate([params["bmu"], params["bls"]], axis=1)

    # pad batch to an f32 sublane multiple (8), then to a multiple of the batch tile
    padded_b = _round_up(max(B, 8), 8)
    tb = min(block_b, padded_b)
    padded_b = _round_up(padded_b, tb)
    if padded_b != B:
        obs = jnp.pad(obs, ((0, padded_b - B), (0, 0)))
        eps = jnp.pad(eps, ((0, padded_b - B), (0, 0)))

    grid = (padded_b // tb,)

    def batch_map(i):        # streamed per batch tile
        return (i, 0)

    def resident_map(i):     # same block every step -> weights stay in VMEM
        return (0, 0)

    in_specs = [
        pl.BlockSpec((tb, obs_dim), batch_map),       # obs
        pl.BlockSpec((tb, act_dim), batch_map),       # eps
        pl.BlockSpec(params["w0"].shape, resident_map),
        pl.BlockSpec(params["b0"].shape, resident_map),
        pl.BlockSpec(params["w1"].shape, resident_map),
        pl.BlockSpec(params["b1"].shape, resident_map),
        pl.BlockSpec(wh.shape, resident_map),
        pl.BlockSpec(bh.shape, resident_map),
    ]
    out_specs = pl.BlockSpec((tb, out_w), batch_map)

    # advisory cost hint for the XLA scheduler
    flops = 2 * padded_b * (obs_dim * hid0 + hid0 * hid1 + hid1 * 2 * act_dim)
    transcendentals = 4 * padded_b * act_dim          # exp, exp, log1p, tanh
    bytes_accessed = 4 * (padded_b * (obs_dim + act_dim + out_w)
                          + obs_dim * hid0 + hid0 + hid0 * hid1 + hid1
                          + hid1 * 2 * act_dim + 2 * act_dim)

    out = pl.pallas_call(
        functools.partial(_actor_kernel, act_dim=act_dim),
        out_shape=jax.ShapeDtypeStruct((padded_b, out_w), jnp.float32),
        grid=grid,
        in_specs=in_specs,
        out_specs=out_specs,
        compiler_params=pltpu.CompilerParams(
            dimension_semantics=("parallel",),        # shard batch tiles across TCs
            vmem_limit_bytes=32 * 1024 * 1024,        # safe on v5e/v6e/v7x
        ),
        cost_estimate=pl.CostEstimate(flops=flops,
                                      transcendentals=transcendentals,
                                      bytes_accessed=bytes_accessed),
    )(obs, eps,
      params["w0"], params["b0"],
      params["w1"], params["b1"],
      wh, bh)

    pi = out[:B, :act_dim]
    mu = out[:B, act_dim:2 * act_dim]
    logp = out[:B, 2 * act_dim]
    return pi, mu, logp


def init_params(key, obs_dim, hidden_sizes, act_dim):
    """Deterministic synthetic parameters. Weights stored as [in, out]."""
    sizes = [obs_dim] + list(hidden_sizes)
    keys = jax.random.split(key, 8)
    params = {}
    params["w0"] = 0.1 * jax.random.normal(keys[0], (sizes[0], sizes[1]), jnp.float32)
    params["b0"] = 0.1 * jax.random.normal(keys[1], (1, sizes[1]), jnp.float32)
    params["w1"] = 0.1 * jax.random.normal(keys[2], (sizes[1], sizes[2]), jnp.float32)
    params["b1"] = 0.1 * jax.random.normal(keys[3], (1, sizes[2]), jnp.float32)
    params["wmu"] = 0.1 * jax.random.normal(keys[4], (sizes[2], act_dim), jnp.float32)
    params["bmu"] = 0.1 * jax.random.normal(keys[5], (1, act_dim), jnp.float32)
    params["wls"] = 0.1 * jax.random.normal(keys[6], (sizes[2], act_dim), jnp.float32)
    params["bls"] = 0.1 * jax.random.normal(keys[7], (1, act_dim), jnp.float32)
    return params


def _reference_forward(obs, eps, params):
    """Plain-JAX reference mirroring the PyTorch module (for sanity check)."""
    h = jax.nn.relu(obs @ params["w0"] + params["b0"])
    h = jax.nn.relu(h @ params["w1"] + params["b1"])
    mu = h @ params["wmu"] + params["bmu"]
    log_std = jnp.clip(h @ params["wls"] + params["bls"], LOG_STD_MIN, LOG_STD_MAX)
    std = jnp.exp(log_std)
    pi = mu + std * eps
    logp = jnp.sum(-0.5 * ((pi - mu) / std) ** 2 - log_std - 0.5 * jnp.log(2.0 * jnp.pi), axis=-1)
    logp = logp - jnp.sum(2.0 * (jnp.log(2.0) - pi - jax.nn.softplus(-2.0 * pi)), axis=-1)
    return jnp.tanh(pi), mu, logp


def _check(B, obs_dim, hidden_sizes, act_dim, seed, block_b):
    key = jax.random.PRNGKey(seed)
    k_obs, k_eps, k_par = jax.random.split(key, 3)
    obs = jax.random.normal(k_obs, (B, obs_dim), jnp.float32)
    # eps stands in for Normal.rsample()'s standard-normal draw (passed in so the
    # kernel is pure and checkable against the reference).
    eps = jax.random.normal(k_eps, (B, act_dim), jnp.float32)
    params = init_params(k_par, obs_dim, hidden_sizes, act_dim)

    pi, mu, logp = squashed_gaussian_actor_forward(obs, eps, params, block_b=block_b)
    jax.block_until_ready((pi, mu, logp))

    pi_ref, mu_ref, logp_ref = _reference_forward(obs, eps, params)
    np.testing.assert_allclose(np.asarray(pi), np.asarray(pi_ref), rtol=1e-5, atol=1e-5)
    np.testing.assert_allclose(np.asarray(mu), np.asarray(mu_ref), rtol=1e-5, atol=1e-5)
    np.testing.assert_allclose(np.asarray(logp), np.asarray(logp_ref), rtol=1e-5, atol=1e-5)


if __name__ == "__main__":
    # small shapes consistent with the module
    _check(B=2, obs_dim=8, hidden_sizes=(32, 32), act_dim=4, seed=0, block_b=512)
    # exercise the multi-step grid + batch padding path (B not a tile multiple)
    _check(B=600, obs_dim=8, hidden_sizes=(32, 32), act_dim=4, seed=1, block_b=256)
    print("KERNEL_OK")
</pallas_src>

<mosaic_0001>
module attributes {stable_mosaic.version = 11 : i64} {
  func.func @_actor_kernel(%arg0: i32, %arg1: memref<8x8xf32, #tpu.memory_space<vmem>>, %arg2: memref<8x4xf32, #tpu.memory_space<vmem>>, %arg3: memref<8x32xf32, #tpu.memory_space<vmem>>, %arg4: memref<1x32xf32, #tpu.memory_space<vmem>>, %arg5: memref<32x32xf32, #tpu.memory_space<vmem>>, %arg6: memref<1x32xf32, #tpu.memory_space<vmem>>, %arg7: memref<32x8xf32, #tpu.memory_space<vmem>>, %arg8: memref<1x8xf32, #tpu.memory_space<vmem>>, %arg9: memref<8x9xf32, #tpu.memory_space<vmem>>) attributes {dimension_semantics = [#tpu.dimension_semantics<parallel>], iteration_bounds = array<i64: 1>, scalar_prefetch = 0 : i64, scratch_operands = 0 : i64, tpu.core_type = #tpu.core_type<tc>, window_params = [{transform_indices = @transform_0, window_bounds = array<i64: 8, 8>}, {transform_indices = @transform_1, window_bounds = array<i64: 8, 4>}, {pipeline_mode = #tpu.pipeline_mode<synchronous>, transform_indices = @transform_2, window_bounds = array<i64: 8, 32>}, {pipeline_mode = #tpu.pipeline_mode<synchronous>, transform_indices = @transform_3, window_bounds = array<i64: 1, 32>}, {pipeline_mode = #tpu.pipeline_mode<synchronous>, transform_indices = @transform_4, window_bounds = array<i64: 32, 32>}, {pipeline_mode = #tpu.pipeline_mode<synchronous>, transform_indices = @transform_5, window_bounds = array<i64: 1, 32>}, {pipeline_mode = #tpu.pipeline_mode<synchronous>, transform_indices = @transform_6, window_bounds = array<i64: 32, 8>}, {pipeline_mode = #tpu.pipeline_mode<synchronous>, transform_indices = @transform_7, window_bounds = array<i64: 1, 8>}, {transform_indices = @transform_8, window_bounds = array<i64: 8, 9>}]} {
    %c0 = arith.constant 0 : index
    %c0_0 = arith.constant 0 : index
    %0 = vector.load %arg1[%c0, %c0_0] : memref<8x8xf32, #tpu.memory_space<vmem>>, vector<8x8xf32>
    %c0_1 = arith.constant 0 : index
    %c0_2 = arith.constant 0 : index
    %1 = vector.load %arg3[%c0_1, %c0_2] : memref<8x32xf32, #tpu.memory_space<vmem>>, vector<8x32xf32>
    %cst = arith.constant dense<0.000000e+00> : vector<8x32xf32>
    %2 = tpu.matmul %0, %1, %cst {dimension_numbers = #tpu.dot_dimension_numbers<[1], [0], [0], [1], [0, 0, 1, 1], [], []>} : vector<8x8xf32>, vector<8x32xf32>, vector<8x32xf32> -> vector<8x32xf32>
    %c0_3 = arith.constant 0 : index
    %c0_4 = arith.constant 0 : index
    %3 = vector.load %arg4[%c0_3, %c0_4] : memref<1x32xf32, #tpu.memory_space<vmem>>, vector<1x32xf32>
    %4 = vector.broadcast %3 : vector<1x32xf32> to vector<8x32xf32>
    %5 = arith.addf %2, %4 : vector<8x32xf32>
    %cst_5 = arith.constant 0.000000e+00 : f32
    %6 = vector.broadcast %cst_5 : f32 to vector<8x32xf32>
    %7 = arith.maximumf %5, %6 : vector<8x32xf32>
    %c0_6 = arith.constant 0 : index
    %c0_7 = arith.constant 0 : index
    %8 = vector.load %arg5[%c0_6, %c0_7] : memref<32x32xf32, #tpu.memory_space<vmem>>, vector<32x32xf32>
    %cst_8 = arith.constant dense<0.000000e+00> : vector<8x32xf32>
    %9 = tpu.matmul %7, %8, %cst_8 {dimension_numbers = #tpu.dot_dimension_numbers<[1], [0], [0], [1], [0, 0, 1, 1], [], []>} : vector<8x32xf32>, vector<32x32xf32>, vector<8x32xf32> -> vector<8x32xf32>
    %c0_9 = arith.constant 0 : index
    %c0_10 = arith.constant 0 : index
    %10 = vector.load %arg6[%c0_9, %c0_10] : memref<1x32xf32, #tpu.memory_space<vmem>>, vector<1x32xf32>
    %11 = vector.broadcast %10 : vector<1x32xf32> to vector<8x32xf32>
    %12 = arith.addf %9, %11 : vector<8x32xf32>
    %cst_11 = arith.constant 0.000000e+00 : f32
    %13 = vector.broadcast %cst_11 : f32 to vector<8x32xf32>
    %14 = arith.maximumf %12, %13 : vector<8x32xf32>
    %c0_12 = arith.constant 0 : index
    %c0_13 = arith.constant 0 : index
    %15 = vector.load %arg7[%c0_12, %c0_13] : memref<32x8xf32, #tpu.memory_space<vmem>>, vector<32x8xf32>
    %cst_14 = arith.constant dense<0.000000e+00> : vector<8x8xf32>
    %16 = tpu.matmul %14, %15, %cst_14 {dimension_numbers = #tpu.dot_dimension_numbers<[1], [0], [0], [1], [0, 0, 1, 1], [], []>} : vector<8x32xf32>, vector<32x8xf32>, vector<8x8xf32> -> vector<8x8xf32>
    %c0_15 = arith.constant 0 : index
    %c0_16 = arith.constant 0 : index
    %17 = vector.load %arg8[%c0_15, %c0_16] : memref<1x8xf32, #tpu.memory_space<vmem>>, vector<1x8xf32>
    %18 = vector.broadcast %17 : vector<1x8xf32> to vector<8x8xf32>
    %19 = arith.addf %16, %18 : vector<8x8xf32>
    %20 = vector.extract_strided_slice %19 {offsets = [0, 0], sizes = [8, 4], strides = [1, 1]} : vector<8x8xf32> to vector<8x4xf32>
    %21 = vector.extract_strided_slice %19 {offsets = [0, 4], sizes = [8, 4], strides = [1, 1]} : vector<8x8xf32> to vector<8x4xf32>
    %cst_17 = arith.constant -2.000000e+01 : f32
    %cst_18 = arith.constant 2.000000e+00 : f32
    %22 = vector.broadcast %cst_17 : f32 to vector<8x4xf32>
    %23 = arith.maximumf %22, %21 : vector<8x4xf32>
    %24 = vector.broadcast %cst_18 : f32 to vector<8x4xf32>
    %25 = arith.minimumf %24, %23 : vector<8x4xf32>
    %26 = math.exp %25 : vector<8x4xf32>
    %c0_19 = arith.constant 0 : index
    %c0_20 = arith.constant 0 : index
    %27 = vector.load %arg2[%c0_19, %c0_20] : memref<8x4xf32, #tpu.memory_space<vmem>>, vector<8x4xf32>
    %28 = arith.mulf %26, %27 : vector<8x4xf32>
    %29 = arith.addf %20, %28 : vector<8x4xf32>
    %30 = arith.mulf %27, %27 : vector<8x4xf32>
    %cst_21 = arith.constant -5.000000e-01 : f32
    %31 = vector.broadcast %cst_21 : f32 to vector<8x4xf32>
    %32 = arith.mulf %31, %30 : vector<8x4xf32>
    %33 = arith.subf %32, %25 : vector<8x4xf32>
    %cst_22 = arith.constant 0.918938517 : f32
    %34 = vector.broadcast %cst_22 : f32 to vector<8x4xf32>
    %35 = arith.subf %33, %34 : vector<8x4xf32>
    %cst_23 = arith.constant -2.000000e+00 : f32
    %36 = vector.broadcast %cst_23 : f32 to vector<8x4xf32>
    %37 = arith.mulf %36, %29 : vector<8x4xf32>
    %cst_24 = arith.constant 0.000000e+00 : f32
    %38 = vector.broadcast %cst_24 : f32 to vector<8x4xf32>
    %39 = arith.maximumf %37, %38 : vector<8x4xf32>
    %40 = math.absf %37 : vector<8x4xf32>
    %cst_25 = arith.constant 0.000000e+00 : f32
    %41 = vector.broadcast %cst_25 : f32 to vector<8x4xf32>
    %42 = arith.subf %41, %40 : vector<8x4xf32>
    %43 = math.exp %42 : vector<8x4xf32>
    %44 = math.log1p %43 : vector<8x4xf32>
    %45 = arith.addf %39, %44 : vector<8x4xf32>
    %cst_26 = arith.constant 0.693147182 : f32
    %46 = vector.broadcast %cst_26 : f32 to vector<8x4xf32>
    %47 = arith.subf %46, %29 : vector<8x4xf32>
    %48 = arith.subf %47, %45 : vector<8x4xf32>
    %cst_27 = arith.constant 2.000000e+00 : f32
    %49 = vector.broadcast %cst_27 : f32 to vector<8x4xf32>
    %50 = arith.mulf %49, %48 : vector<8x4xf32>
    %51 = arith.subf %35, %50 : vector<8x4xf32>
    %cst_28 = arith.constant dense<0.000000e+00> : vector<8xf32>
    %52 = vector.multi_reduction <add>, %51, %cst_28 [1] : vector<8x4xf32> to vector<8xf32>
    %53 = vector.shape_cast %52 : vector<8xf32> to vector<8x1xf32>
    %54 = math.tanh %29 : vector<8x4xf32>
    %55 = tpu.concatenate %54, %20, %53 in 1 : vector<8x4xf32>, vector<8x4xf32>, vector<8x1xf32> -> vector<8x9xf32>
    %c0_29 = arith.constant 0 : index
    %c0_30 = arith.constant 0 : index
    %56 = vector.load %arg9[%c0_29, %c0_30] : memref<8x9xf32, #tpu.memory_space<vmem>>, vector<8x9xf32>
    tpu.vector_store %arg9[%c0_29, %c0_30], %55 {strides = array<i32>} : memref<8x9xf32, #tpu.memory_space<vmem>>, vector<8x9xf32>,
    return
  }
  func.func @transform_0(%arg0: i32) -> (i32, i32) {
    %c0_i32 = arith.constant 0 : i32
    %c0_i32_0 = arith.constant 0 : i32
    return %arg0, %c0_i32 : i32, i32
  }
  func.func @transform_1(%arg0: i32) -> (i32, i32) {
    %c0_i32 = arith.constant 0 : i32
    %c0_i32_0 = arith.constant 0 : i32
    return %arg0, %c0_i32 : i32, i32
  }
  func.func @transform_2(%arg0: i32) -> (i32, i32) {
    %c0_i32 = arith.constant 0 : i32
    %c0_i32_0 = arith.constant 0 : i32
    %c0_i32_1 = arith.constant 0 : i32
    return %c0_i32, %c0_i32_0 : i32, i32
  }
  func.func @transform_3(%arg0: i32) -> (i32, i32) {
    %c0_i32 = arith.constant 0 : i32
    %c0_i32_0 = arith.constant 0 : i32
    %c0_i32_1 = arith.constant 0 : i32
    return %c0_i32, %c0_i32_0 : i32, i32
  }
  func.func @transform_4(%arg0: i32) -> (i32, i32) {
    %c0_i32 = arith.constant 0 : i32
    %c0_i32_0 = arith.constant 0 : i32
    %c0_i32_1 = arith.constant 0 : i32
    return %c0_i32, %c0_i32_0 : i32, i32
  }
  func.func @transform_5(%arg0: i32) -> (i32, i32) {
    %c0_i32 = arith.constant 0 : i32
    %c0_i32_0 = arith.constant 0 : i32
    %c0_i32_1 = arith.constant 0 : i32
    return %c0_i32, %c0_i32_0 : i32, i32
  }
  func.func @transform_6(%arg0: i32) -> (i32, i32) {
    %c0_i32 = arith.constant 0 : i32
    %c0_i32_0 = arith.constant 0 : i32
    %c0_i32_1 = arith.constant 0 : i32
    return %c0_i32, %c0_i32_0 : i32, i32
  }
  func.func @transform_7(%arg0: i32) -> (i32, i32) {
    %c0_i32 = arith.constant 0 : i32
    %c0_i32_0 = arith.constant 0 : i32
    %c0_i32_1 = arith.constant 0 : i32
    return %c0_i32, %c0_i32_0 : i32, i32
  }
  func.func @transform_8(%arg0: i32) -> (i32, i32) {
    %c0_i32 = arith.constant 0 : i32
    %c0_i32_0 = arith.constant 0 : i32
    return %arg0, %c0_i32 : i32, i32
  }
}

</mosaic_0001>

<bundles_post_ra>
// kernel: tpu_custom_call.1
= control target key start
LH: loop header
LB: loop body
LE: loop exit
PB: predicated region body
PF: predicated region fallthrough
CT: control target
= control target key end

     0   :  { %vm39_vm0 = vcmask 64512   ;;  %v435_v3 = vmov 0.0   ;;  %vm436_vm1 = vmmov 0   ;;  %s536_s0 = inlined_call_operand.vmem [shape: f32[8,8], index: 0, kind: input, shape index: {}]   ;;  %s537_s1 = inlined_call_operand.vmem [shape: f32[8,4], index: 1, kind: input, shape index: {}]   ;;  %s538_s2 = inlined_call_operand.vmem [shape: f32[8,32], index: 2, kind: input, shape index: {}]   ;;  %s539_s3 = inlined_call_operand.vmem [shape: f32[1,32], index: 3, kind: input, shape index: {}]   ;;  %s540_s4 = inlined_call_operand.vmem [shape: f32[32,32], index: 4, kind: input, shape index: {}]   ;;  %s541_s5 = inlined_call_operand.vmem [shape: f32[1,32], index: 5, kind: input, shape index: {}]   ;;  %s542_s6 = inlined_call_operand.vmem [shape: f32[32,8], index: 6, kind: input, shape index: {}]   ;;  %s543_s7 = inlined_call_operand.vmem [shape: f32[1,8], index: 7, kind: input, shape index: {}]   ;;  %s544_s8 = inlined_call_operand.hbm [shape: f32[8,9], index: 8, kind: output, shape index: {}]  }
   0x1   :  { %v31_v0 = vld [vmem:[%s538_s2] sm:$0xff]  ;;  %v117_v2 = vld [vmem:[%s540_s4 + $0x18] sm:$0xff]  ;;  %373 = vmatprep.subr.mxu0 %v435_v3  ;;  %375 = vmatprep.mubr.msk.f32.mxu0 %vm436_vm1, %v435_v3 }
   0x2   :  { %v30_v1 = vld [vmem:[%s536_s0] sm:$0xff] }
   0x3   :  { %13 = vsyncpa [#allocation3], 0  ;;  %374 = vmatpush3.msra.mxu0 %v31_v0  ;;  %378 = vmatprep.subr.mxu1 %v435_v3  ;;  %v116_v4 = vld [vmem:[%s540_s4 + $0x10] sm:$0xff]  ;;  %v115_v5 = vld [vmem:[%s540_s4 + $0x8] sm:$0xff]  ;;  %vm125_vm2 = vcmask 261120   ;;  %s437_s25 = smov 4  }
   0x4   :  { %376 = vmatmul.mubr.msk.f32.vlgmr.msra.gmra.mxu0 %vm39_vm0, %v30_v1  ;;  %379 = vmatpush3.msra.mxu1 %v117_v2  ;;  %v114_v6 = vld [vmem:[%s540_s4] sm:$0xff]  ;;  %v203_v7 = vld [vmem:[%s542_s6 + $0x18] sm:$0xff]  ;;  %v202_v13 = vld [vmem:[%s542_s6 + $0x10] sm:$0xff]  ;;  %vm327_vm3 = vcmask 31744   ;;  %vm338_vm5 = vcmask 72704  }
   0x5   :  { %380 = vmatprep.subr.mxu1 %v435_v3  ;;  %386 = vmatprep.mubr.msk.f32.mxu1 %vm436_vm1, %v435_v3  ;;  %v354_v8 = vld [vmem:[%s539_s3] ss:$0 sm:$0xff]  ;;  %v201_v14 = vld [vmem:[%s542_s6 + $0x8] sm:$0xff] }
   0x6   :  { %389 = vmatprep.subr.mxu0 %v435_v3  ;;  %397 = vmatprep.mubr.msk.f32.mxu0 %vm436_vm1, %v435_v3  ;;  %v200_v15 = vld [vmem:[%s542_s6] sm:$0xff] }
   0x7   :  { %381 = vmatpush3.msra.mxu1 %v116_v4  ;;  %390 = vmatpush3.msra.mxu0 %v203_v7  ;;  %v288_v16 = vld [vmem:[%s537_s1] sm:$0xff]  ;;  %s438_s1 = smov 124  }
   0x8   :  { %382 = vmatprep.subr.mxu1 %v435_v3  ;;  %391 = vmatprep.subr.mxu0 %v435_v3  ;;  %v356_v17 = vld [vmem:[%s541_s5] ss:$0 sm:$0xff]  ;;  %v299_v44 = vmul.f32 %v288_v16, %v288_v16  ;;  %s439_s5 = smov [#allocation2]  }
   0x9   :  { %383 = vmatpush3.msra.mxu1 %v115_v5  ;;  %392 = vmatpush3.msra.mxu0 %v202_v13  ;;  %v358_v22 = vld [vmem:[%s543_s7] ss:$0 sm:$0xff]  ;;  %s346_s6 = sshll.u32 %s439_s5, 4  ;;  %s347_s6 = int_to_ptr.vmem [resolvable:$true] %s346_s6 }
   0xa   :  { %384 = vmatprep.subr.mxu1 %v435_v3  ;;  %393 = vmatprep.subr.mxu0 %v435_v3  ;;  %v300_v48 = vmul.f32 -0.5, %v299_v44  ;;  %s413_s7 = scalar_lea.vmem %s347_s6, 128  ;;  %p418_p1 = scmp.lt.s32.totalorder %s347_s6, %s347_s6 }
   0xb   :  { %385 = vmatpush3.msra.mxu1 %v114_v6  ;;  %394 = vmatpush3.msra.mxu0 %v201_v14  ;;  %p414_p0 = scmp.ne.s32.totalorder %s347_s6, %s413_s7  ;;  %p419_p2 = scmp.lt.s32.totalorder %s413_s7, %s413_s7 }
   0xc   :  { %395 = vmatprep.subr.mxu0 %v435_v3  ;;  %290 = vrot.lane.b32.xlu0 %v288_v16, %s437_s25 }
   0xd   :  { %396 = vmatpush3.msra.mxu0 %v200_v15  ;;  %p420_p3 = por %p419_p2, %p418_p1 }
   0xf   :  { %p421_p4 = pnand %p420_p3, %p414_p0 }
  0x7e   :  { %v291_v29 = vpop.permute.xlu0 %290 }
  0xc4   :  { %v109_v9 = vpop.f32.mrf.mxu0 }
  0xc5   :  { %v110_v10 = vadd.f32 %v354_v8, %v109_v9 }
  0xc6   :  { %v377_v11 = vpop.f32.mrf.mxu0 }
  0xc7   :  { %v113_v12 = vmax.f32 %v110_v10, 0.0 }
  0xc9   :  { %387 = vmatmul.mubr.msk.f32.vlgmr.msra.gmra.mxu1 %vm125_vm2, %v113_v12 }
 0x189   :  { %v195_v18 = vpop.f32.mrf.mxu1 }
 0x18a   :  { %v196_v19 = vadd.f32 %v356_v17, %v195_v18 }
 0x18b   :  { %v388_v20 = vpop.f32.mrf.mxu1 }
 0x18c   :  { %v199_v21 = vmax.f32 %v196_v19, 0.0 }
 0x18e   :  { %398 = vmatmul.mubr.msk.f32.vlgmr.msra.gmra.mxu0 %vm125_vm2, %v199_v21 }
 0x24e   :  { %v280_v23 = vpop.f32.mrf.mxu0 }
 0x24f   :  { %v281_v24 = vadd.f32 %v358_v22, %v280_v23 }
 0x250   :  { %v399_v25 = vpop.f32.mrf.mxu0 }
 0x251   :  { %v284_v26 = vmax.f32 %v281_v24, -20.0 }
 0x253   :  { %v285_v27 = vmin.f32 %v284_v26, 2.0 }
 0x255   :  { %302 = vrot.lane.b32.xlu1 %v285_v27, %s438_s1  ;;  %v286_v28 = vmul.f32 1.442695, %v285_v27 }
 0x257   :  { %405 = vpow2.f32 %v286_v28 }
 0x264   :  { %v406_v30 = vpop.eup %405 }
 0x265   :  { %v293_v31 = vmul.f32 %v406_v30, %v291_v29 }
 0x267   :  { %295 = vrot.lane.b32.xlu0 %v293_v31, %s438_s1 }
 0x26b   :  { %333 = vrot.lane.b32.xlu0 %v281_v24, %s437_s25 }
 0x2c7   :  { %v303_v49 = vpop.permute.xlu1 %302 }
 0x2c8   :  { %v305_v54 = vsub.f32 %v300_v48, %v303_v49 }
 0x2ca   :  { %v360_v58 = vadd.f32 -0.9189385, %v305_v54 }
 0x2d9   :  { %v296_v32 = vpop.permute.xlu0 %295 }
 0x2da   :  { %v298_v33 = vadd.f32 %v296_v32, %v281_v24 }
 0x2dc   :  { %v307_v34 = vmul.f32 -2.0, %v298_v33  ;;  %407 = vtanh.f32 %v298_v33  ;;  %v323_v55 = vsub.f32 0.6931472, %v298_v33 }
 0x2dd   :  { %v334_v39 = vpop.permute.xlu0 %333 }
 0x2de   :  { %v309_v35 = vand.u32 2147483647, %v307_v34  ;;  %v308_v52 = vmax.f32 %v307_v34, 0.0 }
 0x2e0   :  { %v310_v36 = vsub.f32 0.0, %v309_v35 }
 0x2e2   :  { %v311_v37 = vmul.f32 1.442695, %v310_v36 }
 0x2e4   :  { %409 = vpow2.f32 %v311_v37 }
 0x2e9   :  { %v408_v38 = vpop.eup %407 }
 0x2ea   :  { %v336_v40 = vsel %vm327_vm3, %v408_v38, %v334_v39 }
 0x2f1   :  { %v410_v41 = vpop.eup %409 }
 0x2f2   :  { %v313_v42 = vadd.f32 1.0, %v410_v41  ;;  %v316_v43 = vmul.f32 -0.5, %v410_v41  ;;  %v319_v46 = vand.u32 2147483647, %v410_v41 }
 0x2f4   :  { %411 = vlog2.f32 %v313_v42  ;;  %v317_v45 = vadd.f32 1.0, %v316_v43  ;;  %vm320_vm4 = vcmp.lt.f32.partialorder %v319_v46, 0.0004427343 }
 0x2f6   :  { %v318_v51 = vmul.f32 %v410_v41, %v317_v45 }
 0x301   :  { %v412_v47 = vpop.eup %411 }
 0x302   :  { %v315_v50 = vmul.f32 0.6931472, %v412_v47 }
 0x304   :  { %v321_v53 = vsel %vm320_vm4, %v318_v51, %v315_v50 }
 0x305   :  { %v322_v56 = vadd.f32 %v321_v53, %v308_v52 }
 0x307   :  { %v324_v57 = vsub.f32 %v323_v55, %v322_v56 }
 0x309   :  { %v325_v59 = vmul.f32 2.0, %v324_v57 }
 0x30b   :  { %v326_v60 = vsub.f32 %v360_v58, %v325_v59 }
 0x30d   :  { %v328_v61 = vsel %vm327_vm3, %v326_v60, 0.0 }
 0x30e   :  { %329 = vadd.xlane.f32.xlu1 %v328_v61 }
 0x397   :  { %v330_v62 = vpop.xlane.xlu1 %329 }
 0x398   :  { %v337_v63 = vsel %vm39_vm0, %v336_v40, %v330_v62 }
 0x399   :  { %339 = vst.msk [vmem:[#allocation2] sm:$0xff] %vm338_vm5, %v337_v63 }
 0x39a   :  { %424 = shalt.err (!%p421_p4)
}
 0x39b   :  { %349 = dma.vmem_to_hbm [thread:$0]  %s347_s6, 128, %s544_s8, [#allocation3]  }
 0x39c   :  { %433 = dma.done.wait [#allocation3], 128  }
 0x39d   :  { %434 = vsyncadd [#allocation3], 4294967168 }
 0x39e   :  { %353 = vsyncpa [#allocation3], 1 }

</bundles_post_ra>
